<compile_context>
chip_gen: v7x
topology: tpu7x:2x2x1
jax: 0.10.0
libtpu: 0.0.40
codegen_flags: <defaults>
</compile_context>

<pallas_src>
import functools

import jax
import jax.numpy as jnp
from jax.experimental import pallas as pl
from jax.experimental.pallas import tpu as pltpu


def _conv1x1_bn_relu_kernel(x_ref, w_ref, b_ref, o_ref, *, use_fma):
    # x_ref: (Cin, thw)    activation tile (lanes = spatial positions)
    # w_ref: (tcout, Cin)  BN-folded 1x1 conv weights
    # b_ref: (tcout, 1)    BN-folded bias (includes conv bias)
    # o_ref: (tcout, thw)
    xv = x_ref[...]
    wv = w_ref[...]
    if use_fma:
        # Tiny contraction dim: unrolled VPU broadcast-FMA, f32 accumulation.
        acc = jnp.zeros(o_ref.shape, jnp.float32)
        for c in range(wv.shape[1]):
            acc = acc + (wv[:, c:c + 1].astype(jnp.float32)
                         * xv[c:c + 1, :].astype(jnp.float32))
    else:
        acc = jnp.dot(wv, xv, preferred_element_type=jnp.float32)
    y = acc + b_ref[...]
    o_ref[...] = jnp.maximum(y, 0.0).astype(o_ref.dtype)


def _round_up(x, m):
    return -(-x // m) * m


@functools.partial(jax.jit, static_argnames=("eps", "tile_hw", "compute_dtype"))
def conv1x1_forward(x_nchw, weight, conv_bias, gamma, beta,
                    running_mean, running_var, eps=1e-5,
                    tile_hw=512, compute_dtype=None):
    """x_nchw: (N, Cin, H, W).  Returns (N, Cout, H, W) in x's dtype."""
    n, cin, h, w = x_nchw.shape
    cout = weight.shape[0]
    out_dtype = x_nchw.dtype

    # ---- fold Conv bias + BatchNorm (eval mode) into a single weight/bias ----
    inv_std = 1.0 / jnp.sqrt(running_var.astype(jnp.float32) + eps)
    scale = gamma.astype(jnp.float32) * inv_std                         # (Cout,)
    w_folded = weight.reshape(cout, cin).astype(jnp.float32) * scale[:, None]
    b_folded = ((conv_bias.astype(jnp.float32)
                 - running_mean.astype(jnp.float32)) * scale
                + beta.astype(jnp.float32))[:, None]                    # (Cout, 1)

    # ---- NCHW-native flattening: (N, Cin, H, W) -> (N, Cin, H*W), free ----
    hw = h * w
    x3 = x_nchw.reshape(n, cin, hw)

    # Lane-dense spatial tiling (thw is a multiple of 128; pad H*W if needed).
    thw = min(_round_up(tile_hw, 128), _round_up(hw, 128))
    hw_pad = _round_up(hw, thw)
    if hw_pad != hw:
        x3 = jnp.pad(x3, ((0, 0), (0, 0), (0, hw_pad - hw)))

    # Cout tiling: keep weight tiles MXU-sized / VMEM-bounded for large Cout.
    tcout = cout if cout <= 256 else 256
    cout_pad = _round_up(cout, tcout)
    if cout_pad != cout:
        w_folded = jnp.pad(w_folded, ((0, cout_pad - cout), (0, 0)))
        b_folded = jnp.pad(b_folded, ((0, cout_pad - cout), (0, 0)))

    # Optional bf16 matmul inputs on v6e/v7x (accumulation stays f32).
    if compute_dtype is not None:
        x3 = x3.astype(compute_dtype)
        w_folded = w_folded.astype(compute_dtype)

    use_fma = cin <= 8   # tiny K: VPU FMA beats pushing a K=4 matmul to the MXU
    kernel = functools.partial(_conv1x1_bn_relu_kernel, use_fma=use_fma)

    grid = (n, cout_pad // tcout, hw_pad // thw)
    # TODO(synk): for very large Cin add a K grid axis ("arbitrary") with an
    #             f32 accumulator scratch; untiled K is fine up to a few 1000.
    out = pl.pallas_call(
        kernel,
        out_shape=jax.ShapeDtypeStruct((n, cout_pad, hw_pad), out_dtype),
        grid_spec=pltpu.PrefetchScalarGridSpec(
            num_scalar_prefetch=0,
            grid=grid,
            in_specs=[
                pl.BlockSpec((None, cin, thw), lambda b, jc, jh: (b, 0, jh)),
                pl.BlockSpec((tcout, cin), lambda b, jc, jh: (jc, 0)),
                pl.BlockSpec((tcout, 1), lambda b, jc, jh: (jc, 0)),
            ],
            out_specs=pl.BlockSpec((None, tcout, thw),
                                   lambda b, jc, jh: (b, jc, jh)),
        ),
        compiler_params=pltpu.CompilerParams(
            dimension_semantics=("parallel", "parallel", "parallel")),
    )(x3, w_folded, b_folded)

    out = out[:, :cout, :hw]
    return out.reshape(n, cout, h, w)


if __name__ == "__main__":
    # Small shapes consistent with the module: batch=2, in_channels=4,
    # out_channels=8, spatial 16x16.
    N, CIN, COUT, H, W = 2, 4, 8, 16, 16

    key = jax.random.PRNGKey(0)
    kx, kw, kb = jax.random.split(key, 3)

    x = jax.random.normal(kx, (N, CIN, H, W), dtype=jnp.float32)
    weight = jax.random.normal(kw, (COUT, CIN, 1, 1), dtype=jnp.float32) * 0.1
    conv_bias = jax.random.normal(kb, (COUT,), dtype=jnp.float32) * 0.1
    gamma = jnp.ones((COUT,), dtype=jnp.float32)
    beta = jnp.zeros((COUT,), dtype=jnp.float32)
    running_mean = jnp.zeros((COUT,), dtype=jnp.float32)
    running_var = jnp.ones((COUT,), dtype=jnp.float32)

    out = conv1x1_forward(x, weight, conv_bias, gamma, beta,
                          running_mean, running_var)
    jax.block_until_ready(out)

    # Pure-JAX reference (eval-mode BN folding).
    eps = 1e-5
    x_flat = x.reshape(N, CIN, H * W)
    conv = jnp.einsum("oc,ncp->nop", weight.reshape(COUT, CIN), x_flat)
    conv = conv + conv_bias[None, :, None]
    scale = gamma / jnp.sqrt(running_var + eps)
    bn = ((conv - running_mean[None, :, None]) * scale[None, :, None]
          + beta[None, :, None])
    ref = jnp.maximum(bn, 0.0).reshape(N, COUT, H, W)

    assert out.shape == (N, COUT, H, W)
    assert jnp.allclose(out, ref, atol=1e-4, rtol=1e-4), "mismatch vs reference"
    print("KERNEL_OK")
</pallas_src>

<mosaic_0001>
module attributes {stable_mosaic.version = 11 : i64} {
  func.func @_conv1x1_bn_relu_kernel(%arg0: i32, %arg1: i32, %arg2: i32, %arg3: memref<1x4x256xf32, #tpu.memory_space<vmem>>, %arg4: memref<8x4xf32, #tpu.memory_space<vmem>>, %arg5: memref<8x1xf32, #tpu.memory_space<vmem>>, %arg6: memref<1x8x256xf32, #tpu.memory_space<vmem>>) attributes {dimension_semantics = [#tpu.dimension_semantics<parallel>, #tpu.dimension_semantics<parallel>, #tpu.dimension_semantics<parallel>], iteration_bounds = array<i64: 2, 1, 1>, scalar_prefetch = 0 : i64, scratch_operands = 0 : i64, tpu.core_type = #tpu.core_type<tc>, window_params = [{transform_indices = @transform_0, window_bounds = array<i64: 1, 4, 256>}, {transform_indices = @transform_1, window_bounds = array<i64: 8, 4>}, {transform_indices = @transform_2, window_bounds = array<i64: 8, 1>}, {transform_indices = @transform_3, window_bounds = array<i64: 1, 8, 256>}]} {
    %c0 = arith.constant 0 : index
    %c0_0 = arith.constant 0 : index
    %c0_1 = arith.constant 0 : index
    %0 = vector.load %arg3[%c0, %c0_0, %c0_1] : memref<1x4x256xf32, #tpu.memory_space<vmem>>, vector<1x4x256xf32>
    %1 = vector.shape_cast %0 : vector<1x4x256xf32> to vector<4x256xf32>
    %c0_2 = arith.constant 0 : index
    %c0_3 = arith.constant 0 : index
    %2 = vector.load %arg4[%c0_2, %c0_3] : memref<8x4xf32, #tpu.memory_space<vmem>>, vector<8x4xf32>
    %cst = arith.constant 0.000000e+00 : f32
    %3 = vector.broadcast %cst : f32 to vector<8x256xf32>
    %4 = vector.extract_strided_slice %2 {offsets = [0, 0], sizes = [8, 1], strides = [1, 1]} : vector<8x4xf32> to vector<8x1xf32>
    %5 = vector.extract_strided_slice %1 {offsets = [0, 0], sizes = [1, 256], strides = [1, 1]} : vector<4x256xf32> to vector<1x256xf32>
    %6 = vector.broadcast %4 : vector<8x1xf32> to vector<8x256xf32>
    %7 = vector.broadcast %5 : vector<1x256xf32> to vector<8x256xf32>
    %8 = arith.mulf %6, %7 : vector<8x256xf32>
    %9 = arith.addf %3, %8 : vector<8x256xf32>
    %10 = vector.extract_strided_slice %2 {offsets = [0, 1], sizes = [8, 1], strides = [1, 1]} : vector<8x4xf32> to vector<8x1xf32>
    %11 = vector.extract_strided_slice %1 {offsets = [1, 0], sizes = [1, 256], strides = [1, 1]} : vector<4x256xf32> to vector<1x256xf32>
    %12 = vector.broadcast %10 : vector<8x1xf32> to vector<8x256xf32>
    %13 = vector.broadcast %11 : vector<1x256xf32> to vector<8x256xf32>
    %14 = arith.mulf %12, %13 : vector<8x256xf32>
    %15 = arith.addf %9, %14 : vector<8x256xf32>
    %16 = vector.extract_strided_slice %2 {offsets = [0, 2], sizes = [8, 1], strides = [1, 1]} : vector<8x4xf32> to vector<8x1xf32>
    %17 = vector.extract_strided_slice %1 {offsets = [2, 0], sizes = [1, 256], strides = [1, 1]} : vector<4x256xf32> to vector<1x256xf32>
    %18 = vector.broadcast %16 : vector<8x1xf32> to vector<8x256xf32>
    %19 = vector.broadcast %17 : vector<1x256xf32> to vector<8x256xf32>
    %20 = arith.mulf %18, %19 : vector<8x256xf32>
    %21 = arith.addf %15, %20 : vector<8x256xf32>
    %22 = vector.extract_strided_slice %2 {offsets = [0, 3], sizes = [8, 1], strides = [1, 1]} : vector<8x4xf32> to vector<8x1xf32>
    %23 = vector.extract_strided_slice %1 {offsets = [3, 0], sizes = [1, 256], strides = [1, 1]} : vector<4x256xf32> to vector<1x256xf32>
    %24 = vector.broadcast %22 : vector<8x1xf32> to vector<8x256xf32>
    %25 = vector.broadcast %23 : vector<1x256xf32> to vector<8x256xf32>
    %26 = arith.mulf %24, %25 : vector<8x256xf32>
    %27 = arith.addf %21, %26 : vector<8x256xf32>
    %c0_4 = arith.constant 0 : index
    %c0_5 = arith.constant 0 : index
    %28 = vector.load %arg5[%c0_4, %c0_5] : memref<8x1xf32, #tpu.memory_space<vmem>>, vector<8x1xf32>
    %29 = vector.broadcast %28 : vector<8x1xf32> to vector<8x256xf32>
    %30 = arith.addf %27, %29 : vector<8x256xf32>
    %cst_6 = arith.constant 0.000000e+00 : f32
    %31 = vector.broadcast %cst_6 : f32 to vector<8x256xf32>
    %32 = arith.maximumf %30, %31 : vector<8x256xf32>
    %c0_7 = arith.constant 0 : index
    %c0_8 = arith.constant 0 : index
    %c0_9 = arith.constant 0 : index
    %33 = vector.load %arg6[%c0_7, %c0_8, %c0_9] : memref<1x8x256xf32, #tpu.memory_space<vmem>>, vector<1x8x256xf32>
    %34 = vector.shape_cast %33 : vector<1x8x256xf32> to vector<8x256xf32>
    %35 = vector.shape_cast %32 : vector<8x256xf32> to vector<1x8x256xf32>
    tpu.vector_store %arg6[%c0_7, %c0_8, %c0_9], %35 {strides = array<i32>} : memref<1x8x256xf32, #tpu.memory_space<vmem>>, vector<1x8x256xf32>,
    return
  }
  func.func @transform_0(%arg0: i32, %arg1: i32, %arg2: i32) -> (i32, i32, i32) {
    %c0_i32 = arith.constant 0 : i32
    %c0_i32_0 = arith.constant 0 : i32
    return %arg0, %c0_i32, %arg2 : i32, i32, i32
  }
  func.func @transform_1(%arg0: i32, %arg1: i32, %arg2: i32) -> (i32, i32) {
    %c0_i32 = arith.constant 0 : i32
    %c0_i32_0 = arith.constant 0 : i32
    return %arg1, %c0_i32 : i32, i32
  }
  func.func @transform_2(%arg0: i32, %arg1: i32, %arg2: i32) -> (i32, i32) {
    %c0_i32 = arith.constant 0 : i32
    %c0_i32_0 = arith.constant 0 : i32
    return %arg1, %c0_i32 : i32, i32
  }
  func.func @transform_3(%arg0: i32, %arg1: i32, %arg2: i32) -> (i32, i32, i32) {
    %c0_i32 = arith.constant 0 : i32
    return %arg0, %arg1, %arg2 : i32, i32, i32
  }
}

</mosaic_0001>

<bundles_post_ra>
// kernel: conv1x1_forward.1
= control target key start
LH: loop header
LB: loop body
LE: loop exit
PB: predicated region body
PF: predicated region fallthrough
CT: control target
= control target key end

     0   :  { %s614_s12 = smov 0   ;;  %s616_s13 = smov 0   ;;  %s657_s0 = inlined_call_operand.vmem [shape: f32[2,4,256], index: 0, kind: input, shape index: {}]   ;;  %s658_s1 = inlined_call_operand.vmem [shape: f32[8,4], index: 1, kind: input, shape index: {}]   ;;  %s659_s2 = inlined_call_operand.vmem [shape: f32[8,1], index: 2, kind: input, shape index: {}]   ;;  %s660_s3 = inlined_call_operand.vmem [shape: f32[2,8,256], index: 3, kind: output, shape index: {}]  }
   0x1   :  { %s618_s14 = smov 0  }
   0x2 LB: > { %s32_s15 = sadd.s32 1, %s584_s13  ;;  %p523_p0 = scmp.ge.s32.totalorder %s588_s14, 1  ;;  %s588_s14 = sphi %s618_s14, %s13_s14   ;;  %s584_s13 = sphi %s616_s13, %s662_s13   ;;  %s580_s12 = sphi %s614_s12, %s661_s12  }
   0x3   : > { %p34_p1 = scmp.ge.s32.totalorder %s32_s15, 2  ;;  %p185_p2 = scmp.lt.s32.totalorder %s588_s14, 3 }
   0x5   : > { %s664_s15 = smov (%p34_p1, %s32_s15), 0  ;;  %p186_p3 = pnand %p523_p0, %p185_p2 }
   0x6   : > { %v262_v0 = vld [vmem:[%s658_s1] sm:$0xff] (!%p186_p3)  ;;  %v590_v1 = vmov (!%p186_p3), 0   ;;  %v591_v2 = vmov (!%p186_p3), 2   ;;  %v592_v3 = vmov (!%p186_p3), 1   ;;  %v593_v4 = vmov (!%p186_p3), 3   ;;  %p230_p4 = scmp.lt.s32.totalorder (!%p186_p3), %s580_s12, 1 }
   0x7   : > { %189 = sbr.rel (%p186_p3) target bundleno = 154 (0x9a), region = 32  ;;  %560 = vset.pattern.permute.xlu0 (!%p186_p3), %v590_v1  ;;  %562 = vset.pattern.permute.xlu1 (!%p186_p3), %v591_v2  ;;  %v369_v5 = vld [vmem:[%s659_s2] sm:$0xff] (!%p186_p3)  ;;  %v269_v6 = vlaneseq (!%p186_p3) }
   0x8   : > { %265 = vperm.xlu0 (!%p186_p3), %560, %v262_v0   ;;  %318 = vperm.xlu1 (!%p186_p3), %562, %v262_v0  }
   0x9   : > { %v270_v7 = vshrl.u32 (!%p186_p3), %v269_v6, 7 }
   0xb   : > { %v271_v8 = vsub.s32 (!%p186_p3), 0, %v270_v7  ;;  %v275_v9 = vsub.s32 (!%p186_p3), 4, %v270_v7  ;;  %v297_v10 = vsub.s32 (!%p186_p3), 1, %v270_v7  ;;  %v301_v11 = vsub.s32 (!%p186_p3), 5, %v270_v7 }
   0xc   : > { %561 = vset.pattern.permute.xlu0 (!%p186_p3), %v592_v3  ;;  %563 = vset.pattern.permute.xlu1 (!%p186_p3), %v593_v4  ;;  %v323_v13 = vsub.s32 (!%p186_p3), 2, %v270_v7  ;;  %v327_v14 = vsub.s32 (!%p186_p3), 6, %v270_v7  ;;  %v349_v15 = vsub.s32 (!%p186_p3), 3, %v270_v7  ;;  %v353_v16 = vsub.s32 (!%p186_p3), 7, %v270_v7 }
   0xd   : > { %292 = vperm.xlu0 (!%p186_p3), %561, %v262_v0   ;;  %344 = vperm.xlu1 (!%p186_p3), %563, %v262_v0  }
   0xe   : > { %s666_s12 = smov (!%p230_p4, %s580_s12), 1 }
   0xf   : > { %s530_s20 = sshll.u32 %s666_s12, 3  ;;  %s531_s24 = sshll.u32 %s666_s12, 4 }
  0x10   : > { %s237_s23 = scalar_lea.vmem %s657_s0, %s530_s20  ;;  %s259_s27 = scalar_lea.vmem %s660_s3, %s531_s24 }
  0x11   : > { %564 = vset.pattern.permute.xlu1 %v590_v1  ;;  %565 = vset.pattern.permute.xlu0 %v590_v1  ;;  %v261_v12 = vld [vmem:[%s237_s23] sm:$0xff] }
  0x12   : > { %372 = vperm.xlu1 %564, %v369_v5   ;;  %v272_v17 = vrot.slane %v261_v12, %v271_v8  ;;  %v276_v18 = vrot.slane %v261_v12, %v275_v9  ;;  %v298_v19 = vrot.slane %v261_v12, %v297_v10  ;;  %v302_v20 = vrot.slane %v261_v12, %v301_v11 }
  0x13   : > { %v324_v21 = vrot.slane %v261_v12, %v323_v13  ;;  %v328_v22 = vrot.slane %v261_v12, %v327_v14  ;;  %v350_v25 = vrot.slane %v261_v12, %v349_v15  ;;  %v354_v26 = vrot.slane %v261_v12, %v353_v16 }
  0x14   : > { %v282_v27 = vrot.slane %v272_v17, %v271_v8  ;;  %v286_v28 = vrot.slane %v276_v18, %v271_v8  ;;  %v308_v29 = vrot.slane %v298_v19, %v297_v10  ;;  %v312_v30 = vrot.slane %v302_v20, %v297_v10 }
  0x15   : > { %v334_v31 = vrot.slane %v324_v21, %v323_v13  ;;  %v338_v32 = vrot.slane %v328_v22, %v323_v13  ;;  %v360_v33 = vrot.slane %v350_v25, %v349_v15  ;;  %v364_v34 = vrot.slane %v354_v26, %v349_v15 }
  0x87   : > { %v266_v23 = vpop.permute.xlu0 %265  ;;  %v319_v24 = vpop.permute.xlu1 %318 }
  0x88   : > { %v287_v37 = vmul.f32 %v282_v27, %v266_v23  ;;  %v288_v38 = vmul.f32 %v286_v28, %v266_v23  ;;  %v339_v41 = vmul.f32 %v334_v31, %v319_v24  ;;  %v340_v42 = vmul.f32 %v338_v32, %v319_v24 }
  0x8c   : > { %v293_v35 = vpop.permute.xlu0 %292  ;;  %v345_v36 = vpop.permute.xlu1 %344 }
  0x8d   : > { %v313_v39 = vmul.f32 %v308_v29, %v293_v35  ;;  %v314_v40 = vmul.f32 %v312_v30, %v293_v35  ;;  %v365_v45 = vmul.f32 %v360_v33, %v345_v36  ;;  %v366_v46 = vmul.f32 %v364_v34, %v345_v36 }
  0x8f   : > { %v315_v43 = vadd.f32 %v313_v39, %v287_v37  ;;  %v316_v44 = vadd.f32 %v314_v40, %v288_v38 }
  0x91   : > { %v341_v47 = vadd.f32 %v339_v41, %v315_v43  ;;  %v342_v48 = vadd.f32 %v340_v42, %v316_v44  ;;  %v373_v49 = vpop.permute.xlu1 %372 }
  0x93   : > { %v367_v50 = vadd.f32 %v365_v45, %v341_v47  ;;  %v368_v51 = vadd.f32 %v366_v46, %v342_v48 }
  0x95   : > { %v375_v52 = vadd.f32 %v373_v49, %v367_v50  ;;  %v376_v53 = vadd.f32 %v373_v49, %v368_v51 }
  0x97   : > { %v377_v54 = vmax.f32 %v375_v52, 0.0  ;;  %v378_v55 = vmax.f32 %v376_v53, 0.0 }
  0x99   : > { %379 = vst [vmem:[%s259_s27] sm:$0xff] %v377_v54  ;;  %380 = vst [vmem:[%s259_s27 + $0x8] sm:$0xff] %v378_v55 }
  0x9a PF: > { %s13_s14 = sadd.s32 1, %s588_s14   ;;  %s661_s12 = smov %s584_s13 }
  0x9b   : > { %p10_p5 = scmp.ge.s32.totalorder %s13_s14, 4   ;;  %s662_s13 = smov %s664_s15 }
  0x9d   :  { %12 = sbr.rel (!%p10_p5) target bundleno = 2 (0x2), region = 68 }

</bundles_post_ra>
